<compile_context>
chip_gen: v6e
topology: v6e:2x2x1
jax: 0.10.0
libtpu: 0.0.40
codegen_flags: <defaults>
</compile_context>

<pallas_src>
import math

import jax
import jax.numpy as jnp
from jax.experimental import pallas as pl
from jax.experimental.pallas import tpu as pltpu


def _nli_mapper_kernel(eh_ref, w_ref, yn_ref, o_ref):
    # eh_ref : (tile_rows, pack*H)  streamed encoder-hidden rows (bf16/f32)
    # w_ref  : (pack*H, pack*O)     resident, pre-transposed W[:, :H]
    #                               (block-diag replicated when pack > 1)
    # yn_ref : (tile_rows, pack*O)  f32: infersent @ W[:, H:].T + bias,
    #                               replicated to match the row->batch pattern
    # o_ref  : (tile_rows, pack*O)  lane-dense output block
    y = jnp.dot(eh_ref[...], w_ref[...], preferred_element_type=jnp.float32)
    o_ref[...] = jnp.maximum(y + yn_ref[...], 0.0).astype(o_ref.dtype)


def _round_up(x, q):
    return ((x + q - 1) // q) * q


def nli_mapper(encoder_hidden, infersent_input, weight, bias, *,
               tile_m=None, compute_dtype=jnp.bfloat16):
    """encoder_hidden: (T, B, H); infersent_input: (B, N);
    weight: (O, H+N) (PyTorch Linear layout); bias: (O,)."""
    T, B, H = encoder_hidden.shape
    Bn, N = infersent_input.shape
    assert Bn == B
    O, F = weight.shape
    assert F == H + N

    out_dtype = encoder_hidden.dtype
    M = T * B

    cdt = jnp.dtype(compute_dtype)
    eh_bytes = cdt.itemsize
    out_bytes = jnp.dtype(out_dtype).itemsize
    sub = 16 if eh_bytes == 2 else 8        # sublane quantum of streamed operand

    # ---- pad O up to a lane multiple when O >= 128 (lane-dense stores) ------
    O_logical = O
    if O >= 128 and O % 128 != 0:
        O_pad = _round_up(O, 128)
        weight = jnp.pad(weight, ((0, O_pad - O), (0, 0)))
        bias = jnp.pad(bias, ((0, O_pad - O),))
        O = O_pad

    # ---- lane-packing factor for narrow outputs (O < 128) -------------------
    pack = 1
    if O < 128 and 128 % O == 0:
        pack = 128 // O
        while pack > 1 and M % pack != 0:          # packing must divide row count
            pack //= 2
        while pack > 1 and pack * pack * H * O * eh_bytes > (4 << 20):
            pack //= 2                             # keep kron'd weight small
    M_rows = M // pack

    # ---- VMEM budget per generation (v7x: 64 MiB/TC, v5e/v6e: 128 MiB) ------
    try:
        vmem_phys = int(pltpu.get_tpu_info().vmem_capacity_bytes)
    except Exception:
        vmem_phys = 64 << 20                       # conservative (v7x-sized) fallback
    budget = min(48 << 20, (vmem_phys * 5) // 8)   # ~40 MiB v7x, 48 MiB v5e/v6e
    vmem_limit = int(max(budget, min((vmem_phys * 3) // 4, budget + (16 << 20))))

    w_bytes = pack * pack * H * O * eh_bytes
    # Double-buffered streamed eh + out; resident w/yn also counted at 2x
    # (default pipeline double-buffers even constant-index blocks).
    bytes_per_row = 2 * H * eh_bytes + 2 * O * out_bytes + 2 * O * 4
    cap_rows = max((budget - 2 * w_bytes) // bytes_per_row, sub * pack)

    # ---- tile size over the flattened (T*B) row axis ------------------------
    quantum = math.lcm(sub * pack, B)              # layout quantum + batch period
    stream_yn = quantum > min(cap_rows, 8192)      # awkward B: stream yn instead
    if stream_yn:
        quantum = sub * pack

    if tile_m is None:
        tile_m = 1024                              # >=512 rows ~ HBM roofline
    tile_m = max(quantum, (min(tile_m, cap_rows) // quantum) * quantum)
    if tile_m >= M and M > quantum:
        # split so the "parallel" axis can feed both v7x TensorCores
        tile_m = _round_up(-(-M // 2), quantum)
    if tile_m >= M:
        # single full-extent block: no (8,128) divisibility constraint, no pad
        tile_m, tile_rows, stream_yn = M, M_rows, False
    else:
        tile_rows = tile_m // pack
    grid_m = pl.cdiv(M_rows, tile_rows)            # ragged last block is masked

    # ---- operands (no padding / no extra HBM copy of encoder_hidden) --------
    eh_in = encoder_hidden.astype(compute_dtype).reshape(M_rows, pack * H)

    w_eh_t = weight[:, :H].T.astype(compute_dtype)           # (H, O) pre-transposed
    if pack > 1:
        w_k = jnp.kron(jnp.eye(pack, dtype=compute_dtype), w_eh_t)  # (pack*H, pack*O)
    else:
        w_k = w_eh_t

    # hoist infersent term + bias out of the hot loop (kept in f32)
    yn = (infersent_input.astype(jnp.float32) @ weight[:, H:].T.astype(jnp.float32)
          + bias.astype(jnp.float32))                         # (B, O)
    if stream_yn:
        yn_in = jnp.tile(yn, (T, 1)).reshape(M_rows, pack * O)
        yn_spec = pl.BlockSpec((tile_rows, pack * O), lambda i: (i, 0))
    else:
        # row m has batch index m % B; tile starts are multiples of B, so one
        # replicated resident block is correct for every grid step.
        yn_in = jnp.tile(yn, (tile_m // B, 1)).reshape(tile_rows, pack * O)
        yn_spec = pl.BlockSpec((tile_rows, pack * O), lambda i: (0, 0))

    out_packed = pl.pallas_call(
        _nli_mapper_kernel,
        out_shape=jax.ShapeDtypeStruct((M_rows, pack * O), out_dtype),
        grid=(grid_m,),
        in_specs=[
            pl.BlockSpec((tile_rows, pack * H), lambda i: (i, 0)),  # streamed eh
            pl.BlockSpec((pack * H, pack * O), lambda i: (0, 0)),   # resident W
            yn_spec,                                                # resident/streamed yn
        ],
        out_specs=pl.BlockSpec((tile_rows, pack * O), lambda i: (i, 0)),
        compiler_params=pltpu.CompilerParams(
            dimension_semantics=("parallel",),
            vmem_limit_bytes=vmem_limit),
    )(eh_in, w_k, yn_in)

    out = out_packed.reshape(T, B, O)
    if O != O_logical:
        out = out[..., :O_logical]
    return out


if __name__ == "__main__":
    # Small shapes consistent with the module: seq T=8, batch B=2,
    # hidden_size H=32, nli_dim N=16, output dim O=H=32.
    T, B, H, N = 8, 2, 32, 16
    O = H

    key = jax.random.PRNGKey(0)
    k_eh, k_inf, k_w, k_b = jax.random.split(key, 4)

    encoder_hidden = jax.random.normal(k_eh, (T, B, H), dtype=jnp.float32)
    infersent_input = jax.random.normal(k_inf, (B, N), dtype=jnp.float32)

    # Deterministic parameter init (PyTorch Linear-style uniform bound).
    fan_in = H + N
    bound = 1.0 / math.sqrt(float(fan_in))
    weight = jax.random.uniform(k_w, (O, H + N), jnp.float32, -bound, bound)
    bias = jax.random.uniform(k_b, (O,), jnp.float32, -bound, bound)

    # Reference in plain JAX (same math as the PyTorch forward), f32.
    inf_rep = jnp.broadcast_to(infersent_input[None, :, :], (T, B, N))
    x_cat = jnp.concatenate([encoder_hidden, inf_rep], axis=2)
    ref = jnp.maximum(jnp.einsum("tbf,of->tbo", x_cat, weight) + bias, 0.0)

    # Default (bf16 streamed operands, f32 accumulation) — bf16-level tolerance.
    out = nli_mapper(encoder_hidden, infersent_input, weight, bias)
    out = jax.block_until_ready(out)
    assert out.shape == (T, B, O)
    assert jnp.allclose(out, ref, atol=3e-2, rtol=3e-2)

    # Full-f32 path — validates the packing / hoisting math at tight tolerance.
    out_f32 = nli_mapper(encoder_hidden, infersent_input, weight, bias,
                         compute_dtype=jnp.float32)
    out_f32 = jax.block_until_ready(out_f32)
    assert jnp.allclose(out_f32, ref, atol=1e-5, rtol=1e-5)

    print("KERNEL_OK")
</pallas_src>

<mosaic_0001>
module attributes {stable_mosaic.version = 11 : i64} {
  func.func @_nli_mapper_kernel(%arg0: i32, %arg1: memref<4x128xbf16, #tpu.memory_space<vmem>>, %arg2: memref<128x128xbf16, #tpu.memory_space<vmem>>, %arg3: memref<4x128xf32, #tpu.memory_space<vmem>>, %arg4: memref<4x128xf32, #tpu.memory_space<vmem>>) attributes {dimension_semantics = [#tpu.dimension_semantics<parallel>], iteration_bounds = array<i64: 1>, scalar_prefetch = 0 : i64, scratch_operands = 0 : i64, tpu.core_type = #tpu.core_type<tc>, window_params = [{transform_indices = @transform_0, window_bounds = array<i64: 4, 128>}, {pipeline_mode = #tpu.pipeline_mode<synchronous>, transform_indices = @transform_1, window_bounds = array<i64: 128, 128>}, {pipeline_mode = #tpu.pipeline_mode<synchronous>, transform_indices = @transform_2, window_bounds = array<i64: 4, 128>}, {transform_indices = @transform_3, window_bounds = array<i64: 4, 128>}]} {
    %c0 = arith.constant 0 : index
    %c0_0 = arith.constant 0 : index
    %0 = vector.load %arg1[%c0, %c0_0] : memref<4x128xbf16, #tpu.memory_space<vmem>>, vector<4x128xbf16>
    %c0_1 = arith.constant 0 : index
    %c0_2 = arith.constant 0 : index
    %1 = vector.load %arg2[%c0_1, %c0_2] : memref<128x128xbf16, #tpu.memory_space<vmem>>, vector<128x128xbf16>
    %cst = arith.constant dense<0.000000e+00> : vector<4x128xf32>
    %2 = tpu.matmul %0, %1, %cst {dimension_numbers = #tpu.dot_dimension_numbers<[1], [0], [0], [1], [0, 0, 1, 1], [], []>} : vector<4x128xbf16>, vector<128x128xbf16>, vector<4x128xf32> -> vector<4x128xf32>
    %c0_3 = arith.constant 0 : index
    %c0_4 = arith.constant 0 : index
    %3 = vector.load %arg3[%c0_3, %c0_4] : memref<4x128xf32, #tpu.memory_space<vmem>>, vector<4x128xf32>
    %4 = arith.addf %2, %3 : vector<4x128xf32>
    %cst_5 = arith.constant 0.000000e+00 : f32
    %5 = vector.broadcast %cst_5 : f32 to vector<4x128xf32>
    %6 = arith.maximumf %4, %5 : vector<4x128xf32>
    %c0_6 = arith.constant 0 : index
    %c0_7 = arith.constant 0 : index
    %7 = vector.load %arg4[%c0_6, %c0_7] : memref<4x128xf32, #tpu.memory_space<vmem>>, vector<4x128xf32>
    tpu.vector_store %arg4[%c0_6, %c0_7], %6 {strides = array<i32>} : memref<4x128xf32, #tpu.memory_space<vmem>>, vector<4x128xf32>,
    return
  }
  func.func @transform_0(%arg0: i32) -> (i32, i32) {
    %c0_i32 = arith.constant 0 : i32
    %c0_i32_0 = arith.constant 0 : i32
    return %arg0, %c0_i32 : i32, i32
  }
  func.func @transform_1(%arg0: i32) -> (i32, i32) {
    %c0_i32 = arith.constant 0 : i32
    %c0_i32_0 = arith.constant 0 : i32
    %c0_i32_1 = arith.constant 0 : i32
    return %c0_i32, %c0_i32_0 : i32, i32
  }
  func.func @transform_2(%arg0: i32) -> (i32, i32) {
    %c0_i32 = arith.constant 0 : i32
    %c0_i32_0 = arith.constant 0 : i32
    %c0_i32_1 = arith.constant 0 : i32
    return %c0_i32, %c0_i32_0 : i32, i32
  }
  func.func @transform_3(%arg0: i32) -> (i32, i32) {
    %c0_i32 = arith.constant 0 : i32
    %c0_i32_0 = arith.constant 0 : i32
    return %arg0, %c0_i32 : i32, i32
  }
}

</mosaic_0001>

<bundles_post_ra>
// kernel: tpu_custom_call.1
= control target key start
LH: loop header
LB: loop body
LE: loop exit
PB: predicated region body
PF: predicated region fallthrough
CT: control target
= control target key end

     0   :  { %8 = vsyncpa [#allocation3], 0  ;;  %s356_s0 = inlined_call_operand.hbm [shape: bf16[4,128], index: 0, kind: input, shape index: {}]   ;;  %s357_s1 = inlined_call_operand.hbm [shape: bf16[128,128], index: 1, kind: input, shape index: {}]   ;;  %s358_s2 = inlined_call_operand.hbm [shape: f32[4,128], index: 2, kind: input, shape index: {}]   ;;  %s359_s3 = inlined_call_operand.hbm [shape: f32[4,128], index: 3, kind: output, shape index: {}]  }
   0x1   :  { %9 = vsyncpa [#allocation6], 0 }
   0x2   :  { %10 = vsyncpa [#allocation4], 0  ;;  %s316_s12 = smov [#allocation5]  }
   0x3   :  { %s26_s13 = sshll.u32 %s316_s12, 4  ;;  %s27_s13 = int_to_ptr.vmem [resolvable:$true] %s26_s13 }
   0x4   :  { %s238_s14 = scalar_lea.vmem %s27_s13, 1024  ;;  %p243_p1 = scmp.lt.s32.totalorder %s27_s13, %s27_s13 }
   0x5   :  { %p239_p0 = scmp.ne.s32.totalorder %s27_s13, %s238_s14  ;;  %p244_p2 = scmp.lt.s32.totalorder %s238_s14, %s238_s14 }
   0x7   :  { %p245_p3 = por %p244_p2, %p243_p1 }
   0x9   :  { %p246_p4 = pnand %p245_p3, %p239_p0 }
   0xb   :  { %249 = shalt.err (!%p246_p4)
}
   0xc   :  { %s317_s15 = smov 64   ;;  %s318_s16 = smov 4  }
   0xd   :  { %32 = dma.hbm_to_vmem [thread:$0]  %s357_s1, 1024, %s27_s13, [#allocation6], %s317_s15, %s317_s15, %s318_s16  }
   0xe   :  { %s319_s19 = smov [#allocation2]   ;;  %s320_s21 = smov [#allocation7]  }
   0xf   :  { %s17_s20 = sshll.u32 %s319_s19, 4  ;;  %s39_s22 = sshll.u32 %s320_s21, 4  ;;  %s18_s20 = int_to_ptr.vmem [resolvable:$true] %s17_s20  ;;  %s40_s22 = int_to_ptr.vmem [resolvable:$true] %s39_s22 }
  0x10   :  { %s258_s23 = scalar_lea.vmem %s18_s20, 32  ;;  %p263_p6 = scmp.lt.s32.totalorder %s18_s20, %s18_s20 }
  0x11   :  { %p259_p5 = scmp.ne.s32.totalorder %s18_s20, %s258_s23  ;;  %p264_p7 = scmp.lt.s32.totalorder %s258_s23, %s258_s23 }
  0x13   :  { %p265_p8 = por %p264_p7, %p263_p6 }
  0x15   :  { %p266_p9 = pnand %p265_p8, %p259_p5 }
  0x17   :  { %269 = shalt.err (!%p266_p9)
}
  0x18   :  { %20 = dma.hbm_to_vmem [thread:$0]  %s356_s0, 32, %s18_s20, [#allocation3]  }
  0x19   :  { %s278_s26 = scalar_lea.vmem %s40_s22, 64  ;;  %p283_p11 = scmp.lt.s32.totalorder %s40_s22, %s40_s22 }
  0x1a   :  { %p279_p10 = scmp.ne.s32.totalorder %s40_s22, %s278_s26  ;;  %p284_p12 = scmp.lt.s32.totalorder %s278_s26, %s278_s26 }
  0x1c   :  { %p285_p13 = por %p284_p12, %p283_p11 }
  0x1e   :  { %p286_p0 = pnand %p285_p13, %p279_p10 }
  0x20   :  { %289 = shalt.err (!%p286_p0)
}
  0x21   :  { %42 = dma.hbm_to_vmem [thread:$0]  %s358_s2, 64, %s40_s22, [#allocation6]  }
  0x22   :  { %310 = dma.done.wait [#allocation3], 32  }
  0x23   :  { %311 = vsyncadd [#allocation3], 4294967264 }
  0x24   :  { %312 = dma.done.wait [#allocation6], 1088  }
  0x25   :  { %313 = vsyncadd [#allocation6], 4294966208  ;;  %v321_v0 = vmov 0.0   ;;  %vm322_vm0 = vmmov 0   ;;  %v222_v1 = vld [vmem:[#allocation5 + $0x38] sm:$0xff]   ;;  %v223_v2 = vld [vmem:[#allocation5 + $0x30] sm:$0xff]  }
  0x26   :  { %194 = vmatprep.subr.bf16.mxu0 %v321_v0  ;;  %210 = vmatprep.mubr.msk.bf16.mxu0 %vm322_vm0, %v321_v0  ;;  %v224_v3 = vld [vmem:[#allocation5 + $0x28] sm:$0xff]   ;;  %v225_v4 = vld [vmem:[#allocation5 + $0x20] sm:$0xff]   ;;  %v226_v5 = vld [vmem:[#allocation5 + $0x18] sm:$0xff]   ;;  %s323_s0 = smov [#allocation8]  }
  0x27   :  { %195 = vmatpush3.bf16.msra.mxu0 %v222_v1  ;;  %v227_v6 = vld [vmem:[#allocation5 + $0x10] sm:$0xff]   ;;  %v228_v7 = vld [vmem:[#allocation5 + $0x8] sm:$0xff]   ;;  %v229_v8 = vld [vmem:[#allocation5] sm:$0xff]   ;;  %s167_s2 = sshll.u32 %s323_s0, 4  ;;  %s168_s2 = int_to_ptr.vmem [resolvable:$true] %s167_s2 }
  0x28   :  { %196 = vmatprep.subr.bf16.mxu0 %v321_v0  ;;  %v53_v9 = vld [vmem:[#allocation2] sm:$0x3]  ;;  %v70_v10 = vld [vmem:[#allocation7] sm:$0xf]  ;;  %s290_s28 = scalar_lea.vmem %s168_s2, 64  ;;  %p295_p2 = scmp.lt.s32.totalorder %s168_s2, %s168_s2 }
  0x29   :  { %p291_p1 = scmp.ne.s32.totalorder %s168_s2, %s290_s28  ;;  %p296_p3 = scmp.lt.s32.totalorder %s290_s28, %s290_s28 }
  0x2b   :  { %197 = vmatpush3.bf16.msra.mxu0 %v223_v2  ;;  %p297_p4 = por %p296_p3, %p295_p2 }
  0x2c   :  { %198 = vmatprep.subr.bf16.mxu0 %v321_v0 }
  0x2d   :  { %p298_p5 = pnand %p297_p4, %p291_p1 }
  0x2f   :  { %199 = vmatpush3.bf16.msra.mxu0 %v224_v3 }
  0x30   :  { %200 = vmatprep.subr.bf16.mxu0 %v321_v0 }
  0x33   :  { %201 = vmatpush3.bf16.msra.mxu0 %v225_v4 }
  0x34   :  { %202 = vmatprep.subr.bf16.mxu0 %v321_v0 }
  0x37   :  { %203 = vmatpush3.bf16.msra.mxu0 %v226_v5 }
  0x38   :  { %204 = vmatprep.subr.bf16.mxu0 %v321_v0 }
  0x3b   :  { %205 = vmatpush3.bf16.msra.mxu0 %v227_v6 }
  0x3c   :  { %206 = vmatprep.subr.bf16.mxu0 %v321_v0 }
  0x3f   :  { %207 = vmatpush3.bf16.msra.mxu0 %v228_v7 }
  0x40   :  { %208 = vmatprep.subr.bf16.mxu0 %v321_v0 }
  0x43   :  { %209 = vmatpush3.bf16.msra.mxu0 %v229_v8 }
  0x46   :  { %211 = vmatmul.mubr.bf16.vlgmr.msra.gmra.mxu0 %v53_v9 }
 0x106   :  { %v153_v11 = vpop.f32.mrf.mxu0 }
 0x107   :  { %v154_v12 = vadd.f32 %v153_v11, %v70_v10 }
 0x108   :  { %v212_v13 = vpop.f32.mrf.mxu0 }
 0x109   :  { %v159_v14 = vmax.f32 %v154_v12, 0.0 }
 0x10a   :  { %v156_v15 = vpop.f32.mrf.mxu0 }
 0x10b   :  { %160 = vst [vmem:[#allocation8] sm:$0xf] %v159_v14 }
 0x10c   :  { %v213_v16 = vpop.f32.mrf.mxu0 }
 0x10d   :  { %301 = shalt.err (!%p298_p5)
}
 0x10e   :  { %170 = dma.vmem_to_hbm [thread:$0]  %s168_s2, 64, %s359_s3, [#allocation4]  }
 0x10f   :  { %314 = dma.done.wait [#allocation4], 64  }
 0x110   :  { %315 = vsyncadd [#allocation4], 4294967232 }
 0x111   :  { %174 = vsyncpa [#allocation3], 1 }
 0x112   :  { %175 = vsyncpa [#allocation6], 1 }
 0x113   :  { %176 = vsyncpa [#allocation4], 1 }

</bundles_post_ra>
